<compile_context>
chip_gen: v7x
topology: tpu7x:2x2x1
jax: 0.10.0
libtpu: 0.0.40
codegen_flags: <defaults>
</compile_context>

<pallas_src>
import functools

import jax
import jax.numpy as jnp
from jax.experimental import pallas as pl
from jax.experimental.pallas import tpu as pltpu


def _round_up(x, m):
    return ((x + m - 1) // m) * m


# ----------------------------- kernel ---------------------------------------


def qnetwork_kernel(x_ref, w1_ref, b1_ref, w2_ref, b2_ref, w3_ref, b3_ref, o_ref):
    """relu(relu(x@W1+b1)@W2+b2)@W3+b3 for one [tm, S] batch tile.

    Weights/biases are whole-array VMEM-resident (no per-step DMA); all matmuls
    accumulate in f32 on the MXU; biases are f32 and added to the f32 accumulator.
    """
    cdt = w1_ref.dtype
    x = x_ref[...].astype(cdt)                                           # in-kernel cast (free VPU filler)
    h1 = jnp.dot(x, w1_ref[...], preferred_element_type=jnp.float32)     # [tm, F1] f32
    h1 = jnp.maximum(h1 + b1_ref[...], 0.0)
    h2 = jnp.dot(h1.astype(cdt), w2_ref[...],
                 preferred_element_type=jnp.float32)                     # [tm, F2] f32
    h2 = jnp.maximum(h2 + b2_ref[...], 0.0)
    q = jnp.dot(h2.astype(cdt), w3_ref[...],
                preferred_element_type=jnp.float32)                      # [tm, A_pad] f32
    o_ref[...] = (q + b3_ref[...]).astype(o_ref.dtype)                   # lane-dense store


# ------------------------- one-time param prep -------------------------------


def default_compute_dtype():
    """bf16 on v6e/v7x (MXU-native); f32 on v5e (no native bf16 VPU, MXU idle anyway)."""
    try:
        kind = jax.devices()[0].device_kind.lower()
    except Exception:  # pragma: no cover - defensive
        return jnp.bfloat16
    if "v5 lite" in kind or "v5e" in kind or "v5lite" in kind:
        return jnp.float32
    return jnp.bfloat16


def prepare_params(w1, b1, w2, b2, w3, b3, compute_dtype=None):
    """One-time weight prep (hoisted OUT of the forward hot path).

    Pads the final layer to a 128-column lane-dense output and pre-casts weights
    to the compute dtype (biases stay f32; they are added to the f32 accumulator).
    Returns (params_tuple, action_size).
    """
    if compute_dtype is None:
        compute_dtype = default_compute_dtype()
    A = w3.shape[1]
    A_pad = _round_up(A, 128)
    w3p = jnp.pad(w3, ((0, 0), (0, A_pad - A)))
    b3p = jnp.pad(b3, ((0, 0), (0, A_pad - A)))
    params = (
        jnp.asarray(w1, compute_dtype),
        jnp.asarray(b1, jnp.float32),
        jnp.asarray(w2, compute_dtype),
        jnp.asarray(b2, jnp.float32),
        jnp.asarray(w3p, compute_dtype),
        jnp.asarray(b3p, jnp.float32),
    )
    return jax.device_put(params), A


# ------------------------------ forward --------------------------------------


def _pick_tm(B, align):
    """Batch tile: one fat step for small B; >=2 steps for moderate B (v7x 2-TC);
    512-row cap for large B (per-step overhead amortized, VMEM far under limit)."""
    Bp = _round_up(B, align)
    if Bp > 512:
        return 512
    if Bp >= 256:
        return _round_up((Bp + 1) // 2, align)   # at least 2 grid steps
    return Bp


@functools.partial(jax.jit, static_argnames=("action_size", "tm", "out_dtype"))
def qnetwork_forward(x, params, *, action_size, tm=None, out_dtype=None):
    """Q-network forward. x: [B, state_size] -> [B, action_size]."""
    w1, b1, w2, b2, w3p, b3p = params
    B, S = x.shape
    A_pad = w3p.shape[1]
    compute_dtype = w1.dtype

    if out_dtype is None:
        # Emitting the padded output in the compute dtype halves the dominant
        # writeback stream on the bf16 path; f32 path stays exact.
        out_dtype = compute_dtype

    bf16_involved = (compute_dtype == jnp.bfloat16) or (jnp.dtype(out_dtype) == jnp.bfloat16)
    align = 16 if bf16_involved else 8

    if tm is None:
        tm = _pick_tm(B, align)
    else:
        tm = _round_up(int(tm), align)   # guard caller-supplied tm vs (8/16,128) tiling

    Bp = _round_up(B, tm)
    if Bp != B:
        x = jnp.pad(x, ((0, Bp - B), (0, 0)))

    resident = pl.BlockSpec(memory_space=pltpu.MemorySpace.VMEM)  # whole-array VMEM residency

    out = pl.pallas_call(
        qnetwork_kernel,
        out_shape=jax.ShapeDtypeStruct((Bp, A_pad), out_dtype),
        grid_spec=pltpu.PrefetchScalarGridSpec(
            num_scalar_prefetch=0,
            grid=(Bp // tm,),
            in_specs=[
                pl.BlockSpec((tm, S), lambda i: (i, 0)),  # x tile (input dtype; cast in-kernel)
                resident,  # W1
                resident,  # b1
                resident,  # W2
                resident,  # b2
                resident,  # W3 (padded to 128 cols)
                resident,  # b3 (padded to 128 cols)
            ],
            out_specs=pl.BlockSpec((tm, A_pad), lambda i: (i, 0)),  # lane-dense store
        ),
        compiler_params=pltpu.CompilerParams(
            dimension_semantics=("parallel",)),  # shards batch steps across TCs (v7x)
    )(x, w1, b1, w2, b2, w3p, b3p)

    # TODO(synk): fuse the downstream Q-value consumer (argmax/TD target) here so
    # the padded lane columns never re-materialize; standalone we pay one slice op.
    return out[:B, :action_size]


# ------------------------- init + reference ----------------------------------


def init_params(key, state_size, action_size, fc1_units=64, fc2_units=64):
    """Matches nn.Linear's default U(-1/sqrt(fan_in), 1/sqrt(fan_in)) init."""
    def linear(key, fan_in, fan_out):
        kw, kb = jax.random.split(key)
        bound = 1.0 / jnp.sqrt(jnp.float32(fan_in))
        w = jax.random.uniform(kw, (fan_in, fan_out), jnp.float32, -bound, bound)
        b = jax.random.uniform(kb, (1, fan_out), jnp.float32, -bound, bound)
        return w, b

    k1, k2, k3 = jax.random.split(key, 3)
    w1, b1 = linear(k1, state_size, fc1_units)
    w2, b2 = linear(k2, fc1_units, fc2_units)
    w3, b3 = linear(k3, fc2_units, action_size)
    return w1, b1, w2, b2, w3, b3


def reference_forward(x, w1, b1, w2, b2, w3, b3):
    h1 = jnp.maximum(x @ w1 + b1, 0.0)
    h2 = jnp.maximum(h1 @ w2 + b2, 0.0)
    return h2 @ w3 + b3


# ------------------------------- main ----------------------------------------


if __name__ == "__main__":
    # Small shapes consistent with the module: batch=16, state_size=8, action_size=4.
    batch, state_size, action_size = 16, 8, 4
    fc1_units, fc2_units = 64, 64

    key = jax.random.PRNGKey(0)
    kx, kp = jax.random.split(key)
    x = jax.random.normal(kx, (batch, state_size), jnp.float32)
    raw_params = init_params(kp, state_size, action_size, fc1_units, fc2_units)
    q_ref = reference_forward(x, *raw_params)

    # f32 compute path: exact match with the pure-JAX reference.
    params_f32, A = prepare_params(*raw_params, compute_dtype=jnp.float32)
    q_f32 = jax.block_until_ready(qnetwork_forward(x, params_f32, action_size=A))
    assert q_f32.shape == (batch, action_size)
    assert jnp.allclose(q_f32, q_ref, atol=1e-5, rtol=1e-5), "f32 mismatch vs reference"

    # bf16 compute path (v6e/v7x MXU; bf16 output halves writeback): relaxed tolerance.
    params_bf16, _ = prepare_params(*raw_params, compute_dtype=jnp.bfloat16)
    q_bf16 = jax.block_until_ready(qnetwork_forward(x, params_bf16, action_size=A))
    assert q_bf16.shape == (batch, action_size)
    assert jnp.allclose(q_bf16.astype(jnp.float32), q_ref, atol=5e-2, rtol=5e-2), \
        "bf16 mismatch vs reference"

    # Ragged batch (not a multiple of the tile alignment): padding + slicing path.
    x_odd = jax.random.normal(kx, (13, state_size), jnp.float32)
    q_odd = jax.block_until_ready(qnetwork_forward(x_odd, params_f32, action_size=A))
    assert q_odd.shape == (13, action_size)
    assert jnp.allclose(q_odd, reference_forward(x_odd, *raw_params),
                        atol=1e-5, rtol=1e-5), "ragged-batch mismatch vs reference"

    # Larger batch exercising the multi-step grid (>=2 steps -> both TCs on v7x).
    x_big = jax.random.normal(kx, (300, state_size), jnp.float32)
    q_big = jax.block_until_ready(qnetwork_forward(x_big, params_f32, action_size=A))
    assert q_big.shape == (300, action_size)
    assert jnp.allclose(q_big, reference_forward(x_big, *raw_params),
                        atol=1e-5, rtol=1e-5), "large-batch mismatch vs reference"

    print("KERNEL_OK")
</pallas_src>

<mosaic_0001>
module attributes {stable_mosaic.version = 11 : i64} {
  func.func @qnetwork_kernel(%arg0: i32, %arg1: memref<16x8xf32, #tpu.memory_space<vmem>>, %arg2: memref<8x64xf32, #tpu.memory_space<vmem>>, %arg3: memref<1x64xf32, #tpu.memory_space<vmem>>, %arg4: memref<64x64xf32, #tpu.memory_space<vmem>>, %arg5: memref<1x64xf32, #tpu.memory_space<vmem>>, %arg6: memref<64x128xf32, #tpu.memory_space<vmem>>, %arg7: memref<1x128xf32, #tpu.memory_space<vmem>>, %arg8: memref<16x128xf32, #tpu.memory_space<vmem>>) attributes {dimension_semantics = [#tpu.dimension_semantics<parallel>], iteration_bounds = array<i64: 1>, scalar_prefetch = 0 : i64, scratch_operands = 0 : i64, tpu.core_type = #tpu.core_type<tc>, window_params = [{transform_indices = @transform_0, window_bounds = array<i64: 16, 8>}, {pipeline_mode = #tpu.pipeline_mode<synchronous>, transform_indices = @transform_1, window_bounds = array<i64: 8, 64>}, {pipeline_mode = #tpu.pipeline_mode<synchronous>, transform_indices = @transform_2, window_bounds = array<i64: 1, 64>}, {pipeline_mode = #tpu.pipeline_mode<synchronous>, transform_indices = @transform_3, window_bounds = array<i64: 64, 64>}, {pipeline_mode = #tpu.pipeline_mode<synchronous>, transform_indices = @transform_4, window_bounds = array<i64: 1, 64>}, {pipeline_mode = #tpu.pipeline_mode<synchronous>, transform_indices = @transform_5, window_bounds = array<i64: 64, 128>}, {pipeline_mode = #tpu.pipeline_mode<synchronous>, transform_indices = @transform_6, window_bounds = array<i64: 1, 128>}, {transform_indices = @transform_7, window_bounds = array<i64: 16, 128>}]} {
    %c0 = arith.constant 0 : index
    %c0_0 = arith.constant 0 : index
    %0 = vector.load %arg1[%c0, %c0_0] : memref<16x8xf32, #tpu.memory_space<vmem>>, vector<16x8xf32>
    %c0_1 = arith.constant 0 : index
    %c0_2 = arith.constant 0 : index
    %1 = vector.load %arg2[%c0_1, %c0_2] : memref<8x64xf32, #tpu.memory_space<vmem>>, vector<8x64xf32>
    %cst = arith.constant dense<0.000000e+00> : vector<16x64xf32>
    %2 = tpu.matmul %0, %1, %cst {dimension_numbers = #tpu.dot_dimension_numbers<[1], [0], [0], [1], [0, 0, 1, 1], [], []>} : vector<16x8xf32>, vector<8x64xf32>, vector<16x64xf32> -> vector<16x64xf32>
    %c0_3 = arith.constant 0 : index
    %c0_4 = arith.constant 0 : index
    %3 = vector.load %arg3[%c0_3, %c0_4] : memref<1x64xf32, #tpu.memory_space<vmem>>, vector<1x64xf32>
    %4 = vector.broadcast %3 : vector<1x64xf32> to vector<16x64xf32>
    %5 = arith.addf %2, %4 : vector<16x64xf32>
    %cst_5 = arith.constant 0.000000e+00 : f32
    %6 = vector.broadcast %cst_5 : f32 to vector<16x64xf32>
    %7 = arith.maximumf %5, %6 : vector<16x64xf32>
    %c0_6 = arith.constant 0 : index
    %c0_7 = arith.constant 0 : index
    %8 = vector.load %arg4[%c0_6, %c0_7] : memref<64x64xf32, #tpu.memory_space<vmem>>, vector<64x64xf32>
    %cst_8 = arith.constant dense<0.000000e+00> : vector<16x64xf32>
    %9 = tpu.matmul %7, %8, %cst_8 {dimension_numbers = #tpu.dot_dimension_numbers<[1], [0], [0], [1], [0, 0, 1, 1], [], []>} : vector<16x64xf32>, vector<64x64xf32>, vector<16x64xf32> -> vector<16x64xf32>
    %c0_9 = arith.constant 0 : index
    %c0_10 = arith.constant 0 : index
    %10 = vector.load %arg5[%c0_9, %c0_10] : memref<1x64xf32, #tpu.memory_space<vmem>>, vector<1x64xf32>
    %11 = vector.broadcast %10 : vector<1x64xf32> to vector<16x64xf32>
    %12 = arith.addf %9, %11 : vector<16x64xf32>
    %cst_11 = arith.constant 0.000000e+00 : f32
    %13 = vector.broadcast %cst_11 : f32 to vector<16x64xf32>
    %14 = arith.maximumf %12, %13 : vector<16x64xf32>
    %c0_12 = arith.constant 0 : index
    %c0_13 = arith.constant 0 : index
    %15 = vector.load %arg6[%c0_12, %c0_13] : memref<64x128xf32, #tpu.memory_space<vmem>>, vector<64x128xf32>
    %cst_14 = arith.constant dense<0.000000e+00> : vector<16x128xf32>
    %16 = tpu.matmul %14, %15, %cst_14 {dimension_numbers = #tpu.dot_dimension_numbers<[1], [0], [0], [1], [0, 0, 1, 1], [], []>} : vector<16x64xf32>, vector<64x128xf32>, vector<16x128xf32> -> vector<16x128xf32>
    %c0_15 = arith.constant 0 : index
    %c0_16 = arith.constant 0 : index
    %17 = vector.load %arg7[%c0_15, %c0_16] : memref<1x128xf32, #tpu.memory_space<vmem>>, vector<1x128xf32>
    %18 = vector.broadcast %17 : vector<1x128xf32> to vector<16x128xf32>
    %19 = arith.addf %16, %18 : vector<16x128xf32>
    %c0_17 = arith.constant 0 : index
    %c0_18 = arith.constant 0 : index
    %20 = vector.load %arg8[%c0_17, %c0_18] : memref<16x128xf32, #tpu.memory_space<vmem>>, vector<16x128xf32>
    tpu.vector_store %arg8[%c0_17, %c0_18], %19 {strides = array<i32>} : memref<16x128xf32, #tpu.memory_space<vmem>>, vector<16x128xf32>,
    return
  }
  func.func @transform_0(%arg0: i32) -> (i32, i32) {
    %c0_i32 = arith.constant 0 : i32
    %c0_i32_0 = arith.constant 0 : i32
    return %arg0, %c0_i32 : i32, i32
  }
  func.func @transform_1(%arg0: i32) -> (i32, i32) {
    %c0_i32 = arith.constant 0 : i32
    %c0_i32_0 = arith.constant 0 : i32
    %c0_i32_1 = arith.constant 0 : i32
    return %c0_i32, %c0_i32_0 : i32, i32
  }
  func.func @transform_2(%arg0: i32) -> (i32, i32) {
    %c0_i32 = arith.constant 0 : i32
    %c0_i32_0 = arith.constant 0 : i32
    %c0_i32_1 = arith.constant 0 : i32
    return %c0_i32, %c0_i32_0 : i32, i32
  }
  func.func @transform_3(%arg0: i32) -> (i32, i32) {
    %c0_i32 = arith.constant 0 : i32
    %c0_i32_0 = arith.constant 0 : i32
    %c0_i32_1 = arith.constant 0 : i32
    return %c0_i32, %c0_i32_0 : i32, i32
  }
  func.func @transform_4(%arg0: i32) -> (i32, i32) {
    %c0_i32 = arith.constant 0 : i32
    %c0_i32_0 = arith.constant 0 : i32
    %c0_i32_1 = arith.constant 0 : i32
    return %c0_i32, %c0_i32_0 : i32, i32
  }
  func.func @transform_5(%arg0: i32) -> (i32, i32) {
    %c0_i32 = arith.constant 0 : i32
    %c0_i32_0 = arith.constant 0 : i32
    %c0_i32_1 = arith.constant 0 : i32
    return %c0_i32, %c0_i32_0 : i32, i32
  }
  func.func @transform_6(%arg0: i32) -> (i32, i32) {
    %c0_i32 = arith.constant 0 : i32
    %c0_i32_0 = arith.constant 0 : i32
    %c0_i32_1 = arith.constant 0 : i32
    return %c0_i32, %c0_i32_0 : i32, i32
  }
  func.func @transform_7(%arg0: i32) -> (i32, i32) {
    %c0_i32 = arith.constant 0 : i32
    %c0_i32_0 = arith.constant 0 : i32
    return %arg0, %c0_i32 : i32, i32
  }
}

</mosaic_0001>

<bundles_post_ra>
// kernel: qnetwork_forward.1
= control target key start
LH: loop header
LB: loop body
LE: loop exit
PB: predicated region body
PF: predicated region fallthrough
CT: control target
= control target key end

     0   :  { %12 = vsyncpa [#allocation3], 0  ;;  %s606_s0 = inlined_call_operand.vmem [shape: f32[16,8], index: 0, kind: input, shape index: {}]   ;;  %s607_s1 = inlined_call_operand.vmem [shape: f32[8,64], index: 1, kind: input, shape index: {}]   ;;  %s608_s2 = inlined_call_operand.vmem [shape: f32[1,64], index: 2, kind: input, shape index: {}]   ;;  %s609_s3 = inlined_call_operand.hbm [shape: f32[64,64], index: 3, kind: input, shape index: {}]   ;;  %s610_s4 = inlined_call_operand.vmem [shape: f32[1,64], index: 4, kind: input, shape index: {}]   ;;  %s611_s5 = inlined_call_operand.hbm [shape: f32[64,128], index: 5, kind: input, shape index: {}]   ;;  %s612_s6 = inlined_call_operand.vmem [shape: f32[1,128], index: 6, kind: input, shape index: {}]   ;;  %s613_s7 = inlined_call_operand.vmem [shape: f32[16,128], index: 7, kind: output, shape index: {}]  }
   0x1   :  { %13 = vsyncpa [#allocation5], 0  ;;  %s510_s24 = smov [#allocation2]   ;;  %s462_s28 = scalar_lea.hbm %s609_s3, 1024 }
   0x2   :  { %s25_s25 = sshll.u32 %s510_s24, 4  ;;  %p463_p0 = scmp.ne.s32.totalorder %s609_s3, %s462_s28  ;;  %s26_s25 = int_to_ptr.vmem [resolvable:$true] %s25_s25 }
   0x3   :  { %p466_p1 = scmp.lt.u32.totalorder %s462_s28, %s609_s3 }
   0x5   :  { %p468_p2 = pnand %p466_p1, %p463_p0 }
   0x7   :  { %471 = shalt.err (!%p468_p2)
}
   0x8   :  { %s472_s10 = scalar_lea.vmem %s26_s25, 1024  ;;  %p477_p4 = scmp.lt.s32.totalorder %s26_s25, %s26_s25 }
   0x9   :  { %p473_p3 = scmp.ne.s32.totalorder %s26_s25, %s472_s10  ;;  %p478_p5 = scmp.lt.s32.totalorder %s472_s10, %s472_s10 }
   0xb   :  { %p479_p6 = por %p478_p5, %p477_p4 }
   0xd   :  { %p480_p7 = pnand %p479_p6, %p473_p3 }
   0xf   :  { %483 = shalt.err (!%p480_p7)
}
  0x10   :  { %s511_s11 = smov 128   ;;  %s512_s12 = smov 8  }
  0x11   :  { %31 = dma.hbm_to_vmem [thread:$0]  %s609_s3, 1024, %s26_s25, [#allocation3], %s511_s11, %s511_s11, %s512_s12  }
  0x12   :  { %s513_s15 = smov [#allocation4]   ;;  %s484_s19 = scalar_lea.hbm %s611_s5, 1024 }
  0x13   :  { %s39_s16 = sshll.u32 %s513_s15, 4  ;;  %p485_p8 = scmp.ne.s32.totalorder %s611_s5, %s484_s19  ;;  %s40_s16 = int_to_ptr.vmem [resolvable:$true] %s39_s16 }
  0x14   :  { %p488_p9 = scmp.lt.u32.totalorder %s484_s19, %s611_s5 }
  0x16   :  { %p490_p10 = pnand %p488_p9, %p485_p8 }
  0x18   :  { %493 = shalt.err (!%p490_p10)
}
  0x19   :  { %s494_s24 = scalar_lea.vmem %s40_s16, 1024  ;;  %p499_p12 = scmp.lt.s32.totalorder %s40_s16, %s40_s16 }
  0x1a   :  { %p495_p11 = scmp.ne.s32.totalorder %s40_s16, %s494_s24  ;;  %p500_p13 = scmp.lt.s32.totalorder %s494_s24, %s494_s24 }
  0x1c   :  { %p501_p0 = por %p500_p13, %p499_p12 }
  0x1e   :  { %p502_p1 = pnand %p501_p0, %p495_p11 }
  0x20   :  { %505 = shalt.err (!%p502_p1)
}
  0x21   :  { %45 = dma.hbm_to_vmem [thread:$0]  %s611_s5, 1024, %s40_s16, [#allocation5], %s511_s11, %s511_s11, %s512_s12  }
  0x22   :  { %506 = dma.done.wait [#allocation3], 1024  }
  0x23   :  { %507 = vsyncadd [#allocation3], 4294966272 }
  0x24   :  { %508 = dma.done.wait [#allocation5], 1024  }
  0x25   :  { %509 = vsyncadd [#allocation5], 4294966272  ;;  %vm64_vm0 = vcmask 64512   ;;  %v56_v0 = vld [vmem:[%s607_s1] sm:$0xff]  ;;  %v55_v2 = vld [vmem:[%s606_s0 + $0x8] sm:$0xff]  ;;  %vm163_vm1 = vcmask 523264  }
  0x26   :  { %v54_v1 = vld [vmem:[%s606_s0] sm:$0xff]  ;;  %383 = vmatprep.subr.mxu0 %v56_v0  ;;  %v149_v4 = vld [vmem:[#allocation2 + $0x8] sm:$0xff]  ;;  %v150_v5 = vld [vmem:[#allocation2 + $0x10] sm:$0xff] }
  0x27   :  { %385 = vmatprep.mubr.msk.f32.mxu0 %vm64_vm0, %v54_v1  ;;  %v148_v3 = vld [vmem:[#allocation2] sm:$0xff]  ;;  %384 = vmatpush3.msra.mxu0 %v56_v0  ;;  %v151_v7 = vld [vmem:[#allocation2 + $0x18] sm:$0xff]  ;;  %v153_v10 = vld [vmem:[#allocation2 + $0x28] sm:$0xff] }
  0x28   :  { %v426_v6 = vpack.c.bf16 %v149_v4, %v148_v3  ;;  %386 = vmatmul.mubr.msk.f32.vlgmr.msra.gmra.mrb[0].mxu0 %vm64_vm0, %v55_v2  ;;  %v430_v8 = vpack.c.bf16 %v151_v7, %v150_v5  ;;  %v152_v9 = vld [vmem:[#allocation2 + $0x20] sm:$0xff]  ;;  %v154_v12 = vld [vmem:[#allocation2 + $0x30] sm:$0xff]  ;;  %v155_v13 = vld [vmem:[#allocation2 + $0x38] sm:$0xff] }
  0x29   :  { %v434_v11 = vpack.c.bf16 %v153_v10, %v152_v9  ;;  %v438_v14 = vpack.c.bf16 %v155_v13, %v154_v12  ;;  %v247_v15 = vld [vmem:[#allocation4] sm:$0xff]  ;;  %v248_v16 = vld [vmem:[#allocation4 + $0x8] sm:$0xff]  ;;  %v249_v17 = vld [vmem:[#allocation4 + $0x10] sm:$0xff] }
  0x2a   :  { %427 = vmatprep.subr.bf16.mxu1 %v426_v6  ;;  %v442_v18 = vpack.c.bf16 %v248_v16, %v247_v15  ;;  %v250_v19 = vld [vmem:[#allocation4 + $0x18] sm:$0xff]  ;;  %v251_v21 = vld [vmem:[#allocation4 + $0x20] sm:$0xff]  ;;  %v252_v22 = vld [vmem:[#allocation4 + $0x28] sm:$0xff] }
  0x2b   :  { %429 = vmatpush3.bf16.msra.mxu1 %v426_v6  ;;  %v446_v20 = vpack.c.bf16 %v250_v19, %v249_v17  ;;  %v450_v23 = vpack.c.bf16 %v252_v22, %v251_v21  ;;  %v351_v24 = vld [vmem:[%s608_s2] ss:$0 sm:$0xff]  ;;  %v253_v31 = vld [vmem:[#allocation4 + $0x30] sm:$0xff]  ;;  %v254_v32 = vld [vmem:[#allocation4 + $0x38] sm:$0xff] }
  0x2c   :  { %431 = vmatprep.subr.bf16.mxu1 %v430_v8  ;;  %443 = vmatprep.subr.bf16.mxu0 %v442_v18  ;;  %v454_v33 = vpack.c.bf16 %v254_v32, %v253_v31  ;;  %v354_v34 = vld [vmem:[%s610_s4] ss:$0 sm:$0xff] }
  0x2d   :  { %445 = vmatpush3.bf16.msra.mxu0 %v442_v18  ;;  %v357_v41 = vld [vmem:[%s612_s6] ss:$0 sm:$0xff] }
  0x2e   :  { %447 = vmatprep.subr.bf16.mxu0 %v446_v20 }
  0x2f   :  { %433 = vmatpush3.bf16.msra.mxu1 %v430_v8 }
  0x30   :  { %435 = vmatprep.subr.bf16.mxu1 %v434_v11 }
  0x31   :  { %449 = vmatpush3.bf16.msra.mxu0 %v446_v20 }
  0x32   :  { %451 = vmatprep.subr.bf16.mxu0 %v450_v23 }
  0x33   :  { %437 = vmatpush3.bf16.msra.mxu1 %v434_v11 }
  0x34   :  { %439 = vmatprep.subr.bf16.mxu1 %v438_v14 }
  0x35   :  { %453 = vmatpush3.bf16.msra.mxu0 %v450_v23 }
  0x36   :  { %455 = vmatprep.subr.bf16.mxu0 %v454_v33 }
  0x37   :  { %441 = vmatpush3.bf16.msra.mxu1 %v438_v14 }
  0x39   :  { %457 = vmatpush3.bf16.msra.mxu0 %v454_v33 }
  0xfb   :  { %v387_v25 = vpop.f32.mrb[0].mxu0 }
  0xfc   :  { %v143_v26 = vadd.f32 %v387_v25, %v351_v24  ;;  %v137_v27 = vpop.f32.mrb[1].mxu0 }
  0xfd   :  { %v138_v28 = vadd.f32 %v351_v24, %v137_v27 }
  0xfe   :  { %v147_v30 = vmax.f32 %v143_v26, 0.0 }
  0xff   :  { %v146_v29 = vmax.f32 %v138_v28, 0.0 }
 0x101   :  { %404 = vmatprep.mubr.msk.f32.mxu1 %vm163_vm1, %v146_v29 }
 0x102   :  { %405 = vmatmul.mubr.msk.f32.vlgmr.msra.gmra.mrb[0].mxu1 %vm163_vm1, %v147_v30 }
 0x1d5   :  { %v406_v35 = vpop.f32.mrb[0].mxu1 }
 0x1d6   :  { %v242_v36 = vadd.f32 %v406_v35, %v354_v34  ;;  %v236_v37 = vpop.f32.mrb[1].mxu1 }
 0x1d7   :  { %v237_v38 = vadd.f32 %v354_v34, %v236_v37 }
 0x1d8   :  { %v246_v40 = vmax.f32 %v242_v36, 0.0 }
 0x1d9   :  { %v245_v39 = vmax.f32 %v237_v38, 0.0 }
 0x1db   :  { %423 = vmatprep.mubr.msk.f32.mxu0 %vm163_vm1, %v245_v39 }
 0x1dc   :  { %424 = vmatmul.mubr.msk.f32.vlgmr.msra.gmra.mrb[2].mxu0 %vm163_vm1, %v246_v40 }
 0x2af   :  { %v425_v42 = vpop.f32.mrb[2].mxu0 }
 0x2b0   :  { %v340_v43 = vadd.f32 %v425_v42, %v357_v41  ;;  %v334_v44 = vpop.f32.mrb[3].mxu0 }
 0x2b1   :  { %v335_v45 = vadd.f32 %v357_v41, %v334_v44 }
 0x2b2   :  { %344 = vst [vmem:[%s613_s7 + $0x8] sm:$0xff] %v340_v43 }
 0x2b3   :  { %343 = vst [vmem:[%s613_s7] sm:$0xff] %v335_v45 }
 0x2b4   :  { %349 = vsyncpa [#allocation3], 1 }
 0x2b5   :  { %350 = vsyncpa [#allocation5], 1 }

</bundles_post_ra>
